<compile_context>
chip_gen: v5e
topology: v5e:2x2
jax: 0.10.0
libtpu: 0.0.40
codegen_flags: <defaults>
</compile_context>

<pallas_src>
import functools
import math

import jax
import jax.numpy as jnp
from jax.experimental import pallas as pl
from jax.experimental.pallas import tpu as pltpu


def _linear_expert_kernel(x_ref, w1_ref, b1_ref, w2_ref, b2_ref, o_ref,
                          acc_ref):
    """One grid step = (token tile i, hidden tile h).

    Computes relu(x @ w1_tile.T + b1_tile) @ w2_tile.T and accumulates the
    partial (TN, d_model) result in a float32 VMEM scratch across the hidden
    (reduction) grid axis.  b2 is added once at the final hidden step and the
    result is cast to the output dtype exactly once.
    """
    h_idx = pl.program_id(1)

    @pl.when(h_idx == 0)
    def _():
        acc_ref[...] = jnp.zeros_like(acc_ref)

    x = x_ref[...]          # (TN, d_model)
    w1 = w1_ref[...]        # (TH, d_model)   -- PyTorch (out, in) layout
    b1 = b1_ref[...]        # (1, TH)
    w2 = w2_ref[...]        # (d_model, TH)

    # h = relu(x @ w1.T + b1): contract the last dims (MXU), f32 accumulation.
    h = jax.lax.dot_general(
        x, w1, (((1,), (1,)), ((), ())),
        preferred_element_type=jnp.float32) + b1.astype(jnp.float32)
    h = jnp.maximum(h, 0.0)

    # partial y = h @ w2.T  (contract the TH dim) -> (TN, d_model)
    acc_ref[...] += jax.lax.dot_general(
        h, w2, (((1,), (1,)), ((), ())),
        preferred_element_type=jnp.float32)

    @pl.when(h_idx == pl.num_programs(1) - 1)
    def _():
        o_ref[...] = (acc_ref[...]
                      + b2_ref[...].astype(jnp.float32)).astype(o_ref.dtype)


@functools.partial(jax.jit, static_argnames=("block_n", "block_h"))
def linear_expert_forward(x, w1, b1, w2, b2, *, block_n=128, block_h=128):
    """Pallas forward for LinearExpert.

    x:  (..., d_model)
    w1: (d_hidden, d_model), b1: (d_hidden,)   [PyTorch nn.Linear layout]
    w2: (d_model, d_hidden), b2: (d_model,)
    """
    orig_shape = x.shape
    d_model = x.shape[-1]
    x2 = x.reshape(-1, d_model)
    n_tokens = x2.shape[0]
    d_hidden = w1.shape[0]

    tn = block_n
    # Hidden (reduction) tile: multiple of 128 lanes; fall back to the full
    # d_hidden if it does not divide evenly.
    th = block_h if (d_hidden % block_h == 0) else d_hidden

    # Pad tokens up to a full MXU-friendly tile; padded rows are sliced off.
    n_pad = pl.cdiv(n_tokens, tn) * tn
    if n_pad != n_tokens:
        x2 = jnp.pad(x2, ((0, n_pad - n_tokens), (0, 0)))

    b1_2d = b1.reshape(1, d_hidden)
    b2_2d = b2.reshape(1, d_model)

    grid = (n_pad // tn, d_hidden // th)

    out = pl.pallas_call(
        _linear_expert_kernel,
        out_shape=jax.ShapeDtypeStruct((n_pad, d_model), x.dtype),
        grid_spec=pltpu.PrefetchScalarGridSpec(
            num_scalar_prefetch=0,
            grid=grid,
            in_specs=[
                pl.BlockSpec((tn, d_model), lambda i, h: (i, 0)),     # tokens
                pl.BlockSpec((th, d_model), lambda i, h: (h, 0)),     # w1 tile
                pl.BlockSpec((1, th), lambda i, h: (0, h)),           # b1 tile
                pl.BlockSpec((d_model, th), lambda i, h: (0, h)),     # w2 tile
                pl.BlockSpec((1, d_model), lambda i, h: (0, 0)),      # b2
            ],
            out_specs=pl.BlockSpec((tn, d_model), lambda i, h: (i, 0)),
            scratch_shapes=[pltpu.VMEM((tn, d_model), jnp.float32)],
        ),
        compiler_params=pltpu.CompilerParams(
            # token tiles are independent (megacore-shardable); the hidden
            # axis is the reduction, kept last.
            dimension_semantics=("parallel", "arbitrary")),
    )(x2, w1, b1_2d, w2, b2_2d)

    out = out[:n_tokens]
    return out.reshape(orig_shape)


if __name__ == "__main__":
    # Small shapes consistent with the module's forward (nn.Linear acts on
    # the last dim, leading dims are batch-like).
    d_model = 128
    d_hidden = 2 * d_model
    batch, seq = 4, 8          # 32 tokens; padded to one 128-row tile inside

    key = jax.random.PRNGKey(0)
    kx, k1, k2, k3, k4 = jax.random.split(key, 5)

    x = jax.random.normal(kx, (batch, seq, d_model), dtype=jnp.float32)

    # Synthetic parameter init mirroring nn.Linear's uniform(-1/sqrt(fan_in)).
    bound1 = 1.0 / math.sqrt(d_model)
    w1 = jax.random.uniform(k1, (d_hidden, d_model), jnp.float32,
                            -bound1, bound1)
    b1 = jax.random.uniform(k2, (d_hidden,), jnp.float32, -bound1, bound1)
    bound2 = 1.0 / math.sqrt(d_hidden)
    w2 = jax.random.uniform(k3, (d_model, d_hidden), jnp.float32,
                            -bound2, bound2)
    b2 = jax.random.uniform(k4, (d_model,), jnp.float32, -bound2, bound2)

    out = linear_expert_forward(x, w1, b1, w2, b2)
    out = jax.block_until_ready(out)

    # Pure-JAX reference mirroring the PyTorch forward.
    ref = jnp.maximum(x @ w1.T + b1, 0.0) @ w2.T + b2

    assert out.shape == x.shape
    assert jnp.allclose(out, ref, atol=1e-4, rtol=1e-4), "mismatch vs reference"

    print("KERNEL_OK")
</pallas_src>

<mosaic_0001>
module attributes {stable_mosaic.version = 11 : i64} {
  func.func @_linear_expert_kernel(%arg0: i32, %arg1: i32, %arg2: memref<128x128xf32, #tpu.memory_space<vmem>>, %arg3: memref<128x128xf32, #tpu.memory_space<vmem>>, %arg4: memref<1x128xf32, #tpu.memory_space<vmem>>, %arg5: memref<128x128xf32, #tpu.memory_space<vmem>>, %arg6: memref<1x128xf32, #tpu.memory_space<vmem>>, %arg7: memref<128x128xf32, #tpu.memory_space<vmem>>, %arg8: memref<128x128xf32, #tpu.memory_space<vmem>>) attributes {dimension_semantics = [#tpu.dimension_semantics<parallel>, #tpu.dimension_semantics<arbitrary>], iteration_bounds = array<i64: 1, 2>, scalar_prefetch = 0 : i64, scratch_operands = 1 : i64, tpu.core_type = #tpu.core_type<tc>, window_params = [{transform_indices = @transform_0, window_bounds = array<i64: 128, 128>}, {transform_indices = @transform_1, window_bounds = array<i64: 128, 128>}, {transform_indices = @transform_2, window_bounds = array<i64: 1, 128>}, {transform_indices = @transform_3, window_bounds = array<i64: 128, 128>}, {pipeline_mode = #tpu.pipeline_mode<synchronous>, transform_indices = @transform_4, window_bounds = array<i64: 1, 128>}, {transform_indices = @transform_5, window_bounds = array<i64: 128, 128>}]} {
    %c0_i32 = arith.constant 0 : i32
    %0 = arith.cmpi eq, %arg1, %c0_i32 : i32
    %1 = arith.extui %0 : i1 to i32
    %c0_i32_0 = arith.constant 0 : i32
    %2 = arith.cmpi ne, %1, %c0_i32_0 : i32
    scf.if %2 {
      %cst_15 = arith.constant 0.000000e+00 : f32
      %19 = vector.broadcast %cst_15 : f32 to vector<128x128xf32>
      %c0_16 = arith.constant 0 : index
      %c0_17 = arith.constant 0 : index
      %20 = vector.load %arg8[%c0_16, %c0_17] : memref<128x128xf32, #tpu.memory_space<vmem>>, vector<128x128xf32>
      tpu.vector_store %arg8[%c0_16, %c0_17], %19 {strides = array<i32>} : memref<128x128xf32, #tpu.memory_space<vmem>>, vector<128x128xf32>,
    } else {
    }
    %c0 = arith.constant 0 : index
    %c0_1 = arith.constant 0 : index
    %3 = vector.load %arg2[%c0, %c0_1] : memref<128x128xf32, #tpu.memory_space<vmem>>, vector<128x128xf32>
    %c0_2 = arith.constant 0 : index
    %c0_3 = arith.constant 0 : index
    %4 = vector.load %arg3[%c0_2, %c0_3] : memref<128x128xf32, #tpu.memory_space<vmem>>, vector<128x128xf32>
    %c0_4 = arith.constant 0 : index
    %c0_5 = arith.constant 0 : index
    %5 = vector.load %arg4[%c0_4, %c0_5] : memref<1x128xf32, #tpu.memory_space<vmem>>, vector<1x128xf32>
    %c0_6 = arith.constant 0 : index
    %c0_7 = arith.constant 0 : index
    %6 = vector.load %arg5[%c0_6, %c0_7] : memref<128x128xf32, #tpu.memory_space<vmem>>, vector<128x128xf32>
    %cst = arith.constant dense<0.000000e+00> : vector<128x128xf32>
    %7 = tpu.matmul %3, %4, %cst {dimension_numbers = #tpu.dot_dimension_numbers<[1], [1], [0], [0], [0, 0, 1, 0], [], []>} : vector<128x128xf32>, vector<128x128xf32>, vector<128x128xf32> -> vector<128x128xf32>
    %8 = vector.broadcast %5 : vector<1x128xf32> to vector<128x128xf32>
    %9 = arith.addf %7, %8 : vector<128x128xf32>
    %cst_8 = arith.constant 0.000000e+00 : f32
    %10 = vector.broadcast %cst_8 : f32 to vector<128x128xf32>
    %11 = arith.maximumf %9, %10 : vector<128x128xf32>
    %c0_9 = arith.constant 0 : index
    %c0_10 = arith.constant 0 : index
    %12 = vector.load %arg8[%c0_9, %c0_10] : memref<128x128xf32, #tpu.memory_space<vmem>>, vector<128x128xf32>
    %cst_11 = arith.constant dense<0.000000e+00> : vector<128x128xf32>
    %13 = tpu.matmul %11, %6, %cst_11 {dimension_numbers = #tpu.dot_dimension_numbers<[1], [1], [0], [0], [0, 0, 1, 0], [], []>} : vector<128x128xf32>, vector<128x128xf32>, vector<128x128xf32> -> vector<128x128xf32>
    %14 = arith.addf %12, %13 : vector<128x128xf32>
    %c0_12 = arith.constant 0 : index
    %c0_13 = arith.constant 0 : index
    %15 = vector.load %arg8[%c0_12, %c0_13] : memref<128x128xf32, #tpu.memory_space<vmem>>, vector<128x128xf32>
    tpu.vector_store %arg8[%c0_12, %c0_13], %14 {strides = array<i32>} : memref<128x128xf32, #tpu.memory_space<vmem>>, vector<128x128xf32>,
    %c1_i32 = arith.constant 1 : i32
    %16 = arith.cmpi eq, %arg1, %c1_i32 : i32
    %17 = arith.extui %16 : i1 to i32
    %c0_i32_14 = arith.constant 0 : i32
    %18 = arith.cmpi ne, %17, %c0_i32_14 : i32
    scf.if %18 {
      %c0_15 = arith.constant 0 : index
      %c0_16 = arith.constant 0 : index
      %19 = vector.load %arg8[%c0_15, %c0_16] : memref<128x128xf32, #tpu.memory_space<vmem>>, vector<128x128xf32>
      %c0_17 = arith.constant 0 : index
      %c0_18 = arith.constant 0 : index
      %20 = vector.load %arg6[%c0_17, %c0_18] : memref<1x128xf32, #tpu.memory_space<vmem>>, vector<1x128xf32>
      %21 = vector.broadcast %20 : vector<1x128xf32> to vector<128x128xf32>
      %22 = arith.addf %19, %21 : vector<128x128xf32>
      %c0_19 = arith.constant 0 : index
      %c0_20 = arith.constant 0 : index
      %23 = vector.load %arg7[%c0_19, %c0_20] : memref<128x128xf32, #tpu.memory_space<vmem>>, vector<128x128xf32>
      tpu.vector_store %arg7[%c0_19, %c0_20], %22 {strides = array<i32>} : memref<128x128xf32, #tpu.memory_space<vmem>>, vector<128x128xf32>,
    } else {
    }
    return
  }
  func.func @transform_0(%arg0: i32, %arg1: i32) -> (i32, i32) {
    %c0_i32 = arith.constant 0 : i32
    %c0_i32_0 = arith.constant 0 : i32
    return %arg0, %c0_i32 : i32, i32
  }
  func.func @transform_1(%arg0: i32, %arg1: i32) -> (i32, i32) {
    %c0_i32 = arith.constant 0 : i32
    %c0_i32_0 = arith.constant 0 : i32
    return %arg1, %c0_i32 : i32, i32
  }
  func.func @transform_2(%arg0: i32, %arg1: i32) -> (i32, i32) {
    %c0_i32 = arith.constant 0 : i32
    %c0_i32_0 = arith.constant 0 : i32
    return %c0_i32, %arg1 : i32, i32
  }
  func.func @transform_3(%arg0: i32, %arg1: i32) -> (i32, i32) {
    %c0_i32 = arith.constant 0 : i32
    %c0_i32_0 = arith.constant 0 : i32
    return %c0_i32, %arg1 : i32, i32
  }
  func.func @transform_4(%arg0: i32, %arg1: i32) -> (i32, i32) {
    %c0_i32 = arith.constant 0 : i32
    %c0_i32_0 = arith.constant 0 : i32
    %c0_i32_1 = arith.constant 0 : i32
    return %c0_i32, %c0_i32_0 : i32, i32
  }
  func.func @transform_5(%arg0: i32, %arg1: i32) -> (i32, i32) {
    %c0_i32 = arith.constant 0 : i32
    %c0_i32_0 = arith.constant 0 : i32
    return %arg0, %c0_i32 : i32, i32
  }
}

</mosaic_0001>

<bundles_post_ra>
// kernel: linear_expert_forward.1
= control target key start
LH: loop header
LB: loop body
LE: loop exit
PB: predicated region body
PF: predicated region fallthrough
CT: control target
= control target key end

     0   :  { %10 = vsyncpa [#allocation4], 0  ;;  %s1301_s0 = inlined_call_operand.vmem [shape: f32[128,128], index: 0, kind: input, shape index: {}]   ;;  %s1302_s1 = inlined_call_operand.hbm [shape: f32[256,128], index: 1, kind: input, shape index: {}]   ;;  %s1303_s2 = inlined_call_operand.vmem [shape: f32[1,256], index: 2, kind: input, shape index: {}]   ;;  %s1304_s3 = inlined_call_operand.hbm [shape: f32[128,256], index: 3, kind: input, shape index: {}]   ;;  %s1305_s4 = inlined_call_operand.vmem [shape: f32[1,128], index: 4, kind: input, shape index: {}]   ;;  %s1306_s5 = inlined_call_operand.vmem [shape: f32[128,128], index: 5, kind: output, shape index: {}]  }
   0x1   :  { %12 = vsyncpa [#allocation4 + $0x1], 0 }
   0x2   :  { %13 = vsyncpa [#allocation6], 0 }
   0x3   :  { %15 = vsyncpa [#allocation6 + $0x1], 0  ;;  %s1047_s18 = smov 0   ;;  %s1049_s19 = smov 0  }
   0x4   :  { %s1051_s20 = smov 0   ;;  %s1053_s21 = smov 0  }
   0x5   :  { %s1055_s22 = smov 0   ;;  %s1057_s23 = smov 0  }
   0x6 LB: > { %s780_s24 = sadd.s32 4294967295, %s1011_s23   ;;  %s30_s25 = sadd.s32 1, %s1007_s22  ;;  %s1011_s23 = sphi %s1057_s23, %s21_s23   ;;  %s1007_s22 = sphi %s1055_s22, %s1314_s22   ;;  %s1003_s21 = sphi %s1053_s21, %s1313_s21   ;;  %s999_s20 = sphi %s1051_s20, %s1312_s20   ;;  %s995_s19 = sphi %s1049_s19, %s1311_s19   ;;  %s991_s18 = sphi %s1047_s18, %s1310_s18  }
   0x7   : > { %p31_p0 = scmp.ge.s32.totalorder %s30_s25, 2  ;;  %s66_s26 = sadd.s32 1, %s999_s20 }
   0x8   : > { %p73_p1 = scmp.ne.s32.totalorder %s999_s20, %s995_s19  ;;  %p74_p2 = scmp.eq.s32.totalorder %s1011_s23, 0 }
   0x9   : > { %s1316_s25 = smov (%p31_p0, %s30_s25), 0  ;;  %p79_p4 = scmp.ne.s32.totalorder %s995_s19, %s991_s18 }
   0xa   : > { %p1083_p3 = por %p74_p2, %p73_p1  ;;  %s63_s28 = ssub.s32 %s1007_s22, %s1316_s25 }
   0xb   : > { %p80_p5 = scmp.eq.s32.totalorder %s780_s24, 0  ;;  %p64_p6 = scmp.eq.s32.totalorder %s63_s28, 0 }
   0xc   : > { %p842_p8 = scmp.lt.s32.totalorder %s1011_s23, 2  ;;  %s1099_s6 = sand.u32 1, %s999_s20  }
   0xd   : > { %p1090_p7 = por %p80_p5, %p79_p4  ;;  %s798_s7 = sshll.u32 %s1007_s22, 7 }
   0xe   : > { %s1096_s30 = scalar_select %p64_p6, %s999_s20, %s66_s26  }
   0xf   : > { %s784_s8 = sshll.u32 %s1099_s6, 7  ;;  %s223_s11 = scalar_lea.hbm %s1302_s1, %s798_s7 }
  0x10   : > { %s224_s12 = sshll.u32 %s223_s11, 4  ;;  %s218_s13 = scalar_lea.vmem [#allocation3], %s784_s8  ;;  %s225_s12 = int_to_ptr.hbm [resolvable:$true] %s224_s12 }
  0x11   : > { %s226_s14 = sshll.u32 %s218_s13, 4  ;;  %p1108_p9 = pnand %p842_p8, %p1083_p3  ;;  %s227_s14 = int_to_ptr.vmem [resolvable:$true] %s226_s14 }
  0x12   : > { %s246_s16 = scalar_lea.vmem [#allocation5], %s784_s8  ;;  %s215_s18 = scalar_lea.sflag [#allocation4], %s1099_s6 }
  0x13   : > { %s253_s17 = sshll.u32 %s246_s16, 4  ;;  %s1013_s24 = smov 128   ;;  %s254_s17 = int_to_ptr.vmem [resolvable:$true] %s253_s17 }
  0x14   : > { %s1014_s26 = smov 8   ;;  %p789_p10 = scmp.ge.s32.totalorder %s1011_s23, 1 }
  0x15   : > { %838 = dma.hbm_to_vmem [thread:$0]  (!%p1108_p9), %s225_s12, 2048, %s227_s14, %s215_s18, %s1013_s24, %s1013_s24, %s1014_s26  }
  0x16   : > { %p261_p11 = scmp.lt.s32.totalorder %s1011_s23, 3  ;;  %s788_s28 = sshll.u32 %s1007_s22, 3 }
  0x17   : > { %s250_s9 = scalar_lea.hbm %s1304_s3, %s788_s28  ;;  %s243_s11 = scalar_lea.sflag [#allocation6], %s1099_s6 }
  0x18   : > { %p262_p12 = pnand %p789_p10, %p261_p11  ;;  %s251_s10 = sshll.u32 %s250_s9, 4  ;;  %s252_s10 = int_to_ptr.hbm [resolvable:$true] %s251_s10 }
  0x19   : > { %s1015_s8 = smov 256   ;;  %s267_s13 = sand.u32 (!%p262_p12), 1, %s995_s19  }
  0x1a   : > { %841 = dma.hbm_to_vmem [thread:$0]  (!%p1108_p9), %s252_s10, 2048, %s254_s17, %s243_s11, %s1015_s8, %s1013_s24, %s1014_s26  }
  0x1b   : > { %265 = sbr.rel (%p262_p12) target bundleno = 470 (0x1d6), region = 40  ;;  %s790_s12 = sshll.u32 (!%p262_p12), %s267_s13, 7 }
  0x1c   : > { %s268_s14 = scalar_lea.sflag (!%p262_p12), [#allocation4], %s267_s13  ;;  %s1125_s16 = scalar_lea.vmem (!%p262_p12), [#allocation3], %s790_s12 }
  0x20   : > { %982 = dma.done.wait (%p1090_p7), %s268_s14, 2048  }
  0x21   : > { %984 = vsyncadd (%p1090_p7), %s268_s14, 4294965248  ;;  %s278_s18 = scalar_lea.sflag [#allocation6], %s267_s13  ;;  %s1131_s28 = scalar_lea.vmem [#allocation5], %s790_s12 }
  0x22   : > { %986 = dma.done.wait (%p1090_p7), %s278_s18, 2048  }
  0x23   : > { %988 = vsyncadd (%p1090_p7), %s278_s18, 4294965248  ;;  %p329_p13 = scmp.lt.s32.totalorder %s1003_s21, 1  ;;  %p792_p0 = scmp.ne.s32.totalorder %s1003_s21, 0 }
  0x25   : > { %s1139_s6 = scalar_select %p329_p13, %s1003_s21, 1 }
  0x26   : > { %341 = sbr.rel (%p792_p0) target bundleno = 60 (0x3c), region = 52 }
  0x27   : > { %s331_s24 = scalar_lea.vmem %s1303_s2, %s1139_s6 }
  0x2b   : > { %v1016_v0 = vmov 0.0  }
  0x2c   : > { %342 = vst [vmem:[#allocation2 + $0x30] sm:$0xff] %v1016_v0 }
  0x2d   : > { %343 = vst [vmem:[#allocation2] sm:$0xff] %v1016_v0 }
  0x2e   : > { %344 = vst [vmem:[#allocation2 + $0x58] sm:$0xff] %v1016_v0 }
  0x2f   : > { %345 = vst [vmem:[#allocation2 + $0x18] sm:$0xff] %v1016_v0 }
  0x30   : > { %346 = vst [vmem:[#allocation2 + $0x50] sm:$0xff] %v1016_v0 }
  0x31   : > { %347 = vst [vmem:[#allocation2 + $0x68] sm:$0xff] %v1016_v0 }
  0x32   : > { %348 = vst [vmem:[#allocation2 + $0x8] sm:$0xff] %v1016_v0 }
  0x33   : > { %349 = vst [vmem:[#allocation2 + $0x48] sm:$0xff] %v1016_v0 }
  0x34   : > { %350 = vst [vmem:[#allocation2 + $0x40] sm:$0xff] %v1016_v0 }
  0x35   : > { %351 = vst [vmem:[#allocation2 + $0x20] sm:$0xff] %v1016_v0 }
  0x36   : > { %352 = vst [vmem:[#allocation2 + $0x10] sm:$0xff] %v1016_v0 }
  0x37   : > { %353 = vst [vmem:[#allocation2 + $0x38] sm:$0xff] %v1016_v0 }
  0x38   : > { %354 = vst [vmem:[#allocation2 + $0x60] sm:$0xff] %v1016_v0 }
  0x39   : > { %355 = vst [vmem:[#allocation2 + $0x70] sm:$0xff] %v1016_v0 }
  0x3a   : > { %356 = vst [vmem:[#allocation2 + $0x78] sm:$0xff] %v1016_v0 }
  0x3b   : > { %357 = vst [vmem:[#allocation2 + $0x28] sm:$0xff] %v1016_v0 }
  0x3c PF: > { %v389_v1 = vld [vmem:[%s1125_s16 + $0x78] sm:$0xff]  ;;  %v388_v2 = vld [vmem:[%s1125_s16 + $0x70] sm:$0xff]  ;;  %v387_v3 = vld [vmem:[%s1125_s16 + $0x68] sm:$0xff]  ;;  %p793_p1 = scmp.ne.s32.totalorder %s1003_s21, 1 }
  0x3d   : > { %799 = vmatpush.xpose.msra.mxu2 %v389_v1  ;;  %410 = vmatpush.xpose.msra.mxu0 %v389_v1  ;;  %v386_v4 = vld [vmem:[%s1125_s16 + $0x60] sm:$0xff]  ;;  %v385_v5 = vld [vmem:[%s1125_s16 + $0x58] sm:$0xff]  ;;  %v384_v6 = vld [vmem:[%s1125_s16 + $0x50] sm:$0xff] }
  0x3e   : > { %v383_v7 = vld [vmem:[%s1125_s16 + $0x48] sm:$0xff]  ;;  %v382_v8 = vld [vmem:[%s1125_s16 + $0x40] sm:$0xff]  ;;  %v381_v9 = vld [vmem:[%s1125_s16 + $0x38] sm:$0xff] }
  0x3f   : > { %v380_v10 = vld [vmem:[%s1125_s16 + $0x30] sm:$0xff]  ;;  %v379_v11 = vld [vmem:[%s1125_s16 + $0x28] sm:$0xff]  ;;  %v378_v12 = vld [vmem:[%s1125_s16 + $0x20] sm:$0xff] }
  0x40   : > { %v377_v13 = vld [vmem:[%s1125_s16 + $0x18] sm:$0xff]  ;;  %v376_v14 = vld [vmem:[%s1125_s16 + $0x10] sm:$0xff]  ;;  %v375_v15 = vld [vmem:[%s1125_s16 + $0x8] sm:$0xff] }
  0x41   : > { %800 = vmatpush.xpose.msra.mxu2 %v388_v2  ;;  %411 = vmatpush.xpose.msra.mxu0 %v388_v2  ;;  %v374_v16 = vld [vmem:[%s1125_s16] sm:$0xff]  ;;  %v367_v19 = vld [vmem:[%s1301_s0 + $0x48] sm:$0xff]  ;;  %v368_v21 = vld [vmem:[%s1301_s0 + $0x50] sm:$0xff] }
  0x42   : > { %v366_v17 = vld [vmem:[%s1301_s0 + $0x40] sm:$0xff]  ;;  %v359_v20 = vld [vmem:[%s1301_s0 + $0x8] sm:$0xff]  ;;  %v360_v22 = vld [vmem:[%s1301_s0 + $0x10] sm:$0xff] }
  0x43   : > { %v358_v18 = vld [vmem:[%s1301_s0] sm:$0xff]  ;;  %v369_v23 = vld [vmem:[%s1301_s0 + $0x58] sm:$0xff]  ;;  %v405_v26 = vld [vmem:[%s1131_s28 + $0x70] sm:$0xff] }
  0x44   : > { %v361_v24 = vld [vmem:[%s1301_s0 + $0x18] sm:$0xff]  ;;  %v370_v27 = vld [vmem:[%s1301_s0 + $0x60] sm:$0xff]  ;;  %v404_v29 = vld [vmem:[%s1131_s28 + $0x68] sm:$0xff] }
  0x45   : > { %801 = vmatpush.xpose.msra.mxu2 %v387_v3  ;;  %412 = vmatpush.xpose.msra.mxu0 %v387_v3  ;;  %v406_v25 = vld [vmem:[%s1131_s28 + $0x78] sm:$0xff]  ;;  %v362_v28 = vld [vmem:[%s1301_s0 + $0x20] sm:$0xff]  ;;  %v371_v31 = vld [vmem:[%s1301_s0 + $0x68] sm:$0xff] }
  0x46   : > { %815 = vmatpush.xpose.msra.mxu3 %v406_v25  ;;  %507 = vmatpush.xpose.msra.mxu1 %v406_v25  ;;  %v403_v30 = vld [vmem:[%s1131_s28 + $0x60] sm:$0xff]  ;;  %v363_v32 = vld [vmem:[%s1301_s0 + $0x28] sm:$0xff]  ;;  %v402_v33 = vld [vmem:[%s1131_s28 + $0x58] sm:$0xff] }
  0x47   : > { %v401_v34 = vld [vmem:[%s1131_s28 + $0x50] sm:$0xff]  ;;  %v400_v37 = vld [vmem:[%s1131_s28 + $0x48] sm:$0xff]  ;;  %v399_v38 = vld [vmem:[%s1131_s28 + $0x40] sm:$0xff] }
  0x48   : > { %v372_v35 = vld [vmem:[%s1301_s0 + $0x70] sm:$0xff]  ;;  %v373_v39 = vld [vmem:[%s1301_s0 + $0x78] sm:$0xff]  ;;  %v396_v43 = vld [vmem:[%s1131_s28 + $0x28] sm:$0xff] }
  0x49   : > { %802 = vmatpush.xpose.msra.mxu2 %v386_v4  ;;  %413 = vmatpush.xpose.msra.mxu0 %v386_v4  ;;  %v364_v36 = vld [vmem:[%s1301_s0 + $0x30] sm:$0xff]  ;;  %v365_v40 = vld [vmem:[%s1301_s0 + $0x38] sm:$0xff]  ;;  %v395_v44 = vld [vmem:[%s1131_s28 + $0x20] sm:$0xff] }
  0x4a   : > { %816 = vmatpush.xpose.msra.mxu3 %v405_v26  ;;  %508 = vmatpush.xpose.msra.mxu1 %v405_v26  ;;  %v398_v41 = vld [vmem:[%s1131_s28 + $0x38] sm:$0xff]  ;;  %v397_v42 = vld [vmem:[%s1131_s28 + $0x30] sm:$0xff]  ;;  %v392_v47 = vld [vmem:[%s1131_s28 + $0x8] sm:$0xff] }
  0x4b   : > { %v394_v45 = vld [vmem:[%s1131_s28 + $0x18] sm:$0xff]  ;;  %v393_v46 = vld [vmem:[%s1131_s28 + $0x10] sm:$0xff]  ;;  %v391_v48 = vld [vmem:[%s1131_s28] sm:$0xff] }
  0x4c   : > { %v895_v49 = vld [vmem:[%s331_s24] ss:$0 sm:$0xff] }
  0x4d   : > { %803 = vmatpush.xpose.msra.mxu2 %v385_v5  ;;  %414 = vmatpush.xpose.msra.mxu0 %v385_v5 }
  0x4e   : > { %817 = vmatpush.xpose.msra.mxu3 %v404_v29  ;;  %509 = vmatpush.xpose.msra.mxu1 %v404_v29 }
  0x51   : > { %804 = vmatpush.xpose.msra.mxu2 %v384_v6  ;;  %415 = vmatpush.xpose.msra.mxu0 %v384_v6 }
  0x52   : > { %818 = vmatpush.xpose.msra.mxu3 %v403_v30  ;;  %510 = vmatpush.xpose.msra.mxu1 %v403_v30 }
  0x55   : > { %805 = vmatpush.xpose.msra.mxu2 %v383_v7  ;;  %416 = vmatpush.xpose.msra.mxu0 %v383_v7 }
  0x56   : > { %819 = vmatpush.xpose.msra.mxu3 %v402_v33  ;;  %511 = vmatpush.xpose.msra.mxu1 %v402_v33 }
  0x59   : > { %806 = vmatpush.xpose.msra.mxu2 %v382_v8  ;;  %417 = vmatpush.xpose.msra.mxu0 %v382_v8 }
  0x5a   : > { %820 = vmatpush.xpose.msra.mxu3 %v401_v34  ;;  %512 = vmatpush.xpose.msra.mxu1 %v401_v34  ;;  %v491_v34 = vld [vmem:[#allocation2 + $0x30] sm:$0xff] }
  0x5d   : > { %807 = vmatpush.xpose.msra.mxu2 %v381_v9  ;;  %418 = vmatpush.xpose.msra.mxu0 %v381_v9 }
  0x5e   : > { %821 = vmatpush.xpose.msra.mxu3 %v400_v37  ;;  %513 = vmatpush.xpose.msra.mxu1 %v400_v37  ;;  %v492_v37 = vld [vmem:[#allocation2] sm:$0xff] }
  0x61   : > { %808 = vmatpush.xpose.msra.mxu2 %v380_v10  ;;  %419 = vmatpush.xpose.msra.mxu0 %v380_v10 }
  0x62   : > { %822 = vmatpush.xpose.msra.mxu3 %v399_v38  ;;  %514 = vmatpush.xpose.msra.mxu1 %v399_v38 }
  0x65   : > { %809 = vmatpush.xpose.msra.mxu2 %v379_v11  ;;  %420 = vmatpush.xpose.msra.mxu0 %v379_v11 }
  0x66   : > { %823 = vmatpush.xpose.msra.mxu3 %v398_v41  ;;  %515 = vmatpush.xpose.msra.mxu1 %v398_v41 }
  0x69   : > { %810 = vmatpush.xpose.msra.mxu2 %v378_v12  ;;  %421 = vmatpush.xpose.msra.mxu0 %v378_v12 }
  0x6a   : > { %824 = vmatpush.xpose.msra.mxu3 %v397_v42  ;;  %516 = vmatpush.xpose.msra.mxu1 %v397_v42 }
  0x6d   : > { %811 = vmatpush.xpose.msra.mxu2 %v377_v13  ;;  %422 = vmatpush.xpose.msra.mxu0 %v377_v13 }
  0x6e   : > { %825 = vmatpush.xpose.msra.mxu3 %v396_v43  ;;  %517 = vmatpush.xpose.msra.mxu1 %v396_v43  ;;  %v493_v43 = vld [vmem:[#allocation2 + $0x58] sm:$0xff] }
  0x71   : > { %812 = vmatpush.xpose.msra.mxu2 %v376_v14  ;;  %423 = vmatpush.xpose.msra.mxu0 %v376_v14 }
  0x72   : > { %826 = vmatpush.xpose.msra.mxu3 %v395_v44  ;;  %518 = vmatpush.xpose.msra.mxu1 %v395_v44 }
  0x75   : > { %813 = vmatpush.xpose.msra.mxu2 %v375_v15  ;;  %424 = vmatpush.xpose.msra.mxu0 %v375_v15 }
  0x76   : > { %827 = vmatpush.xpose.msra.mxu3 %v394_v45  ;;  %519 = vmatpush.xpose.msra.mxu1 %v394_v45 }
  0x79   : > { %814 = vmatpush.xpose.msra.mxu2 %v374_v16  ;;  %425 = vmatpush.xpose.msra.mxu0 %v374_v16 }
  0x7a   : > { %828 = vmatpush.xpose.msra.mxu3 %v393_v46  ;;  %520 = vmatpush.xpose.msra.mxu1 %v393_v46  ;;  %v500_v46 = vld [vmem:[#allocation2 + $0x20] sm:$0xff] }
  0x7c   : > { %450 = vmatmul.f32.vlgmr.msra.gmra.mxu2 %v366_v17  ;;  %426 = vmatmul.f32.vlgmr.msra.gmra.mxu0 %v358_v18 }
  0x7e   : > { %829 = vmatpush.xpose.msra.mxu3 %v392_v47  ;;  %521 = vmatpush.xpose.msra.mxu1 %v392_v47 }
  0x82   : > { %830 = vmatpush.xpose.msra.mxu3 %v391_v48  ;;  %522 = vmatpush.xpose.msra.mxu1 %v391_v48 }
  0x84   : > { %453 = vmatmul.f32.gmra.mxu2 %v367_v19  ;;  %429 = vmatmul.f32.gmra.mxu0 %v359_v20 }
  0x8c   : > { %456 = vmatmul.f32.gmra.mxu2 %v368_v21  ;;  %432 = vmatmul.f32.gmra.mxu0 %v360_v22 }
  0x94   : > { %459 = vmatmul.f32.gmra.mxu2 %v369_v23  ;;  %435 = vmatmul.f32.gmra.mxu0 %v361_v24 }
  0x9c   : > { %462 = vmatmul.f32.gmra.mxu2 %v370_v27  ;;  %438 = vmatmul.f32.gmra.mxu0 %v362_v28 }
  0xa4   : > { %465 = vmatmul.f32.gmra.mxu2 %v371_v31  ;;  %441 = vmatmul.f32.gmra.mxu0 %v363_v32 }
  0xac   : > { %468 = vmatmul.f32.gmra.mxu2 %v372_v35  ;;  %444 = vmatmul.f32.gmra.mxu0 %v364_v36 }
  0xb4   : > { %471 = vmatmul.f32.gmra.mxu2 %v373_v39  ;;  %447 = vmatmul.f32.gmra.mxu0 %v365_v40  ;;  %v499_v40 = vld [vmem:[#allocation2 + $0x40] sm:$0xff] }
  0xf9   : > { %v427_v50 = vpop.f32.mrf.mxu0 }
  0xfa   : > { %v428_v51 = vadd.f32 %v895_v49, %v427_v50 }
  0xfc   : > { %v475_v52 = vmax.f32 %v428_v51, 0.0 }
  0xfe   : > { %523 = vmatmul.f32.vlgmr.msra.gmra.mxu1 %v475_v52  ;;  %v501_v52 = vld [vmem:[#allocation2 + $0x10] sm:$0xff] }
  0xff   : > { %v451_v53 = vpop.f32.mrf.mxu2 }
 0x100   : > { %v452_v54 = vadd.f32 %v895_v49, %v451_v53 }
 0x101   : > { %v430_v55 = vpop.f32.mrf.mxu0 }
 0x102   : > { %v483_v56 = vmax.f32 %v452_v54, 0.0  ;;  %v431_v57 = vadd.f32 %v895_v49, %v430_v55  ;;  %v495_v55 = vld [vmem:[#allocation2 + $0x50] sm:$0xff] }
 0x104   : > { %547 = vmatmul.f32.vlgmr.msra.gmra.mxu3 %v483_v56  ;;  %v476_v58 = vmax.f32 %v431_v57, 0.0 }
 0x106   : > { %526 = vmatmul.f32.gmra.mxu1 %v476_v58  ;;  %v502_v58 = vld [vmem:[#allocation2 + $0x38] sm:$0xff] }
 0x107   : > { %v454_v59 = vpop.f32.mrf.mxu2 }
 0x108   : > { %v455_v60 = vadd.f32 %v895_v49, %v454_v59 }
 0x109   : > { %v433_v61 = vpop.f32.mrf.mxu0 }
 0x10a   : > { %v484_v62 = vmax.f32 %v455_v60, 0.0  ;;  %v434_v63 = vadd.f32 %v895_v49, %v433_v61  ;;  %v496_v61 = vld [vmem:[#allocation2 + $0x68] sm:$0xff] }
 0x10c   : > { %550 = vmatmul.f32.gmra.mxu3 %v484_v62  ;;  %v477_v0 = vmax.f32 %v434_v63, 0.0 }
 0x10e   : > { %529 = vmatmul.f32.gmra.mxu1 %v477_v0  ;;  %v503_v0 = vld [vmem:[#allocation2 + $0x60] sm:$0xff] }
 0x10f   : > { %v457_v1 = vpop.f32.mrf.mxu2 }
 0x110   : > { %v458_v2 = vadd.f32 %v895_v49, %v457_v1 }
 0x111   : > { %v436_v3 = vpop.f32.mrf.mxu0 }
 0x112   : > { %v485_v4 = vmax.f32 %v458_v2, 0.0  ;;  %v437_v5 = vadd.f32 %v895_v49, %v436_v3  ;;  %v497_v3 = vld [vmem:[#allocation2 + $0x8] sm:$0xff] }
 0x114   : > { %553 = vmatmul.f32.gmra.mxu3 %v485_v4  ;;  %v478_v6 = vmax.f32 %v437_v5, 0.0 }
 0x116   : > { %532 = vmatmul.f32.gmra.mxu1 %v478_v6  ;;  %v504_v6 = vld [vmem:[#allocation2 + $0x70] sm:$0xff] }
 0x117   : > { %v460_v7 = vpop.f32.mrf.mxu2 }
 0x118   : > { %v461_v8 = vadd.f32 %v895_v49, %v460_v7 }
 0x119   : > { %v439_v9 = vpop.f32.mrf.mxu0 }
 0x11a   : > { %v486_v10 = vmax.f32 %v461_v8, 0.0  ;;  %v440_v11 = vadd.f32 %v895_v49, %v439_v9  ;;  %v498_v9 = vld [vmem:[#allocation2 + $0x48] sm:$0xff] }
 0x11c   : > { %556 = vmatmul.f32.gmra.mxu3 %v486_v10  ;;  %v479_v12 = vmax.f32 %v440_v11, 0.0 }
 0x11e   : > { %535 = vmatmul.f32.gmra.mxu1 %v479_v12  ;;  %v505_v12 = vld [vmem:[#allocation2 + $0x78] sm:$0xff] }
 0x11f   : > { %v463_v13 = vpop.f32.mrf.mxu2 }
 0x120   : > { %v464_v14 = vadd.f32 %v895_v49, %v463_v13 }
 0x121   : > { %v442_v15 = vpop.f32.mrf.mxu0 }
 0x122   : > { %v487_v16 = vmax.f32 %v464_v14, 0.0  ;;  %v443_v17 = vadd.f32 %v895_v49, %v442_v15  ;;  %v506_v15 = vld [vmem:[#allocation2 + $0x28] sm:$0xff] }
 0x124   : > { %559 = vmatmul.f32.gmra.mxu3 %v487_v16  ;;  %v480_v18 = vmax.f32 %v443_v17, 0.0 }
 0x126   : > { %538 = vmatmul.f32.gmra.mxu1 %v480_v18 }
 0x127   : > { %v466_v19 = vpop.f32.mrf.mxu2 }
 0x128   : > { %v467_v20 = vadd.f32 %v895_v49, %v466_v19 }
 0x129   : > { %v445_v21 = vpop.f32.mrf.mxu0 }
 0x12a   : > { %v488_v22 = vmax.f32 %v467_v20, 0.0  ;;  %v446_v23 = vadd.f32 %v895_v49, %v445_v21 }
 0x12c   : > { %562 = vmatmul.f32.gmra.mxu3 %v488_v22  ;;  %v481_v24 = vmax.f32 %v446_v23, 0.0 }
 0x12e   : > { %541 = vmatmul.f32.gmra.mxu1 %v481_v24 }
 0x12f   : > { %v469_v25 = vpop.f32.mrf.mxu2 }
 0x130   : > { %v470_v26 = vadd.f32 %v895_v49, %v469_v25 }
 0x131   : > { %v448_v27 = vpop.f32.mrf.mxu0 }
 0x132   : > { %v489_v28 = vmax.f32 %v470_v26, 0.0  ;;  %v449_v29 = vadd.f32 %v895_v49, %v448_v27 }
 0x134   : > { %565 = vmatmul.f32.gmra.mxu3 %v489_v28  ;;  %v482_v30 = vmax.f32 %v449_v29, 0.0 }
 0x136   : > { %544 = vmatmul.f32.gmra.mxu1 %v482_v30 }
 0x137   : > { %v472_v31 = vpop.f32.mrf.mxu2 }
 0x138   : > { %v473_v32 = vadd.f32 %v895_v49, %v472_v31  ;;  %v494_v49 = vld [vmem:[#allocation2 + $0x18] sm:$0xff] }
 0x13a   : > { %v490_v33 = vmax.f32 %v473_v32, 0.0 }
 0x13c   : > { %568 = vmatmul.f32.gmra.mxu3 %v490_v33 }
 0x17b   : > { %v524_v35 = vpop.f32.mrf.mxu1 }
 0x17c   : > { %v572_v36 = vadd.f32 %v524_v35, %v491_v34 }
 0x17e   : > { %588 = vst [vmem:[#allocation2 + $0x30] sm:$0xff] %v572_v36 }
 0x183   : > { %v527_v38 = vpop.f32.mrf.mxu1 }
 0x184   : > { %v573_v39 = vadd.f32 %v527_v38, %v492_v37 }
 0x186   : > { %589 = vst [vmem:[#allocation2] sm:$0xff] %v573_v39 }
 0x187   : > { %v548_v41 = vpop.f32.mrf.mxu3 }
 0x188   : > { %v580_v42 = vadd.f32 %v548_v41, %v499_v40 }
 0x18a   : > { %596 = vst [vmem:[#allocation2 + $0x40] sm:$0xff] %v580_v42 }
 0x18b   : > { %v530_v44 = vpop.f32.mrf.mxu1 }
 0x18c   : > { %v574_v45 = vadd.f32 %v530_v44, %v493_v43 }
 0x18e   : > { %590 = vst [vmem:[#allocation2 + $0x58] sm:$0xff] %v574_v45 }
 0x18f   : > { %v551_v47 = vpop.f32.mrf.mxu3 }
 0x190   : > { %v581_v48 = vadd.f32 %v551_v47, %v500_v46 }
 0x192   : > { %597 = vst [vmem:[#allocation2 + $0x20] sm:$0xff] %v581_v48 }
 0x193   : > { %v533_v50 = vpop.f32.mrf.mxu1 }
 0x194   : > { %v575_v51 = vadd.f32 %v533_v50, %v494_v49 }
 0x196   : > { %591 = vst [vmem:[#allocation2 + $0x18] sm:$0xff] %v575_v51 }
 0x197   : > { %v554_v53 = vpop.f32.mrf.mxu3 }
 0x198   : > { %v582_v54 = vadd.f32 %v554_v53, %v501_v52 }
 0x19a   : > { %598 = vst [vmem:[#allocation2 + $0x10] sm:$0xff] %v582_v54 }
 0x19b   : > { %v536_v56 = vpop.f32.mrf.mxu1 }
 0x19c   : > { %v576_v57 = vadd.f32 %v536_v56, %v495_v55 }
 0x19e   : > { %592 = vst [vmem:[#allocation2 + $0x50] sm:$0xff] %v576_v57 }
 0x19f   : > { %v557_v59 = vpop.f32.mrf.mxu3 }
 0x1a0   : > { %v583_v60 = vadd.f32 %v557_v59, %v502_v58 }
 0x1a2   : > { %599 = vst [vmem:[#allocation2 + $0x38] sm:$0xff] %v583_v60 }
 0x1a3   : > { %v539_v62 = vpop.f32.mrf.mxu1 }
 0x1a4   : > { %v577_v63 = vadd.f32 %v539_v62, %v496_v61 }
 0x1a6   : > { %593 = vst [vmem:[#allocation2 + $0x68] sm:$0xff] %v577_v63 }
 0x1a7   : > { %v560_v1 = vpop.f32.mrf.mxu3 }
 0x1a8   : > { %v584_v2 = vadd.f32 %v560_v1, %v503_v0 }
 0x1aa   : > { %600 = vst [vmem:[#allocation2 + $0x60] sm:$0xff] %v584_v2 }
 0x1ab   : > { %v542_v4 = vpop.f32.mrf.mxu1 }
 0x1ac   : > { %v578_v5 = vadd.f32 %v542_v4, %v497_v3 }
 0x1ae   : > { %594 = vst [vmem:[#allocation2 + $0x8] sm:$0xff] %v578_v5 }
 0x1af   : > { %v563_v7 = vpop.f32.mrf.mxu3 }
 0x1b0   : > { %v585_v8 = vadd.f32 %v563_v7, %v504_v6 }
 0x1b2   : > { %601 = vst [vmem:[#allocation2 + $0x70] sm:$0xff] %v585_v8 }
 0x1b3   : > { %v545_v10 = vpop.f32.mrf.mxu1 }
 0x1b4   : > { %v579_v11 = vadd.f32 %v545_v10, %v498_v9 }
 0x1b6   : > { %595 = vst [vmem:[#allocation2 + $0x48] sm:$0xff] %v579_v11 }
 0x1b7   : > { %v566_v13 = vpop.f32.mrf.mxu3 }
 0x1b8   : > { %v586_v14 = vadd.f32 %v566_v13, %v505_v12 }
 0x1ba   : > { %602 = vst [vmem:[#allocation2 + $0x78] sm:$0xff] %v586_v14 }
 0x1be   : > { %607 = sbr.rel (%p793_p1) target bundleno = 470 (0x1d6), region = 56 }
 0x1bf   : > { %v569_v16 = vpop.f32.mrf.mxu3 }
 0x1c0   : > { %v587_v17 = vadd.f32 %v569_v16, %v506_v15 }
 0x1c2   : > { %603 = vst [vmem:[#allocation2 + $0x28] sm:$0xff] %v587_v17 }
 0x1c3   : > { %v608_v18 = vld [vmem:[#allocation2 + $0x30] sm:$0xff]  ;;  %v896_v19 = vld [vmem:[%s1305_s4] ss:$0 sm:$0xff]  ;;  %v610_v21 = vld [vmem:[#allocation2 + $0x58] sm:$0xff] }
 0x1c4   : > { %v609_v20 = vld [vmem:[#allocation2] sm:$0xff]  ;;  %v611_v22 = vld [vmem:[#allocation2 + $0x18] sm:$0xff]  ;;  %v628_v23 = vadd.f32 %v896_v19, %v608_v18  ;;  %v630_v25 = vadd.f32 %v896_v19, %v610_v21  ;;  %v612_v26 = vld [vmem:[#allocation2 + $0x50] sm:$0xff] }
 0x1c5   : > { %v629_v24 = vadd.f32 %v896_v19, %v609_v20  ;;  %v613_v27 = vld [vmem:[#allocation2 + $0x68] sm:$0xff]  ;;  %v631_v28 = vadd.f32 %v896_v19, %v611_v22  ;;  %v632_v30 = vadd.f32 %v896_v19, %v612_v26  ;;  %v616_v33 = vld [vmem:[#allocation2 + $0x40] sm:$0xff]  ;;  %v618_v37 = vld [vmem:[#allocation2 + $0x10] sm:$0xff] }
 0x1c6   : > { %v614_v29 = vld [vmem:[#allocation2 + $0x8] sm:$0xff]  ;;  %644 = vst [vmem:[%s1306_s5] sm:$0xff] %v628_v23  ;;  %v633_v32 = vadd.f32 %v896_v19, %v613_v27  ;;  %v617_v35 = vld [vmem:[#allocation2 + $0x20] sm:$0xff]  ;;  %v636_v38 = vadd.f32 %v896_v19, %v616_v33  ;;  %v619_v39 = vld [vmem:[#allocation2 + $0x38] sm:$0xff]  ;;  %v638_v42 = vadd.f32 %v896_v19, %v618_v37 }
 0x1c7   : > { %v615_v31 = vld [vmem:[#allocation2 + $0x48] sm:$0xff]  ;;  %645 = vst [vmem:[%s1306_s5 + $0x8] sm:$0xff] %v629_v24  ;;  %v634_v34 = vadd.f32 %v896_v19, %v614_v29  ;;  %v637_v40 = vadd.f32 %v896_v19, %v617_v35  ;;  %v620_v41 = vld [vmem:[#allocation2 + $0x60] sm:$0xff]  ;;  %v621_v43 = vld [vmem:[#allocation2 + $0x70] sm:$0xff]  ;;  %v639_v44 = vadd.f32 %v896_v19, %v619_v39 }
 0x1c8   : > { %646 = vst [vmem:[%s1306_s5 + $0x10] sm:$0xff] %v630_v25  ;;  %v635_v36 = vadd.f32 %v896_v19, %v615_v31  ;;  %v622_v45 = vld [vmem:[#allocation2 + $0x78] sm:$0xff]  ;;  %v640_v46 = vadd.f32 %v896_v19, %v620_v41  ;;  %v641_v48 = vadd.f32 %v896_v19, %v621_v43 }
 0x1c9   : > { %647 = vst [vmem:[%s1306_s5 + $0x18] sm:$0xff] %v631_v28  ;;  %v623_v47 = vld [vmem:[#allocation2 + $0x28] sm:$0xff]  ;;  %v642_v49 = vadd.f32 %v896_v19, %v622_v45 }
 0x1ca   : > { %648 = vst [vmem:[%s1306_s5 + $0x20] sm:$0xff] %v632_v30  ;;  %v643_v50 = vadd.f32 %v896_v19, %v623_v47 }
 0x1cb   : > { %649 = vst [vmem:[%s1306_s5 + $0x28] sm:$0xff] %v633_v32 }
 0x1cc   : > { %650 = vst [vmem:[%s1306_s5 + $0x30] sm:$0xff] %v634_v34 }
 0x1cd   : > { %651 = vst [vmem:[%s1306_s5 + $0x38] sm:$0xff] %v635_v36 }
 0x1ce   : > { %652 = vst [vmem:[%s1306_s5 + $0x40] sm:$0xff] %v636_v38 }
 0x1cf   : > { %653 = vst [vmem:[%s1306_s5 + $0x48] sm:$0xff] %v637_v40 }
 0x1d0   : > { %654 = vst [vmem:[%s1306_s5 + $0x50] sm:$0xff] %v638_v42 }
 0x1d1   : > { %655 = vst [vmem:[%s1306_s5 + $0x58] sm:$0xff] %v639_v44 }
 0x1d2   : > { %656 = vst [vmem:[%s1306_s5 + $0x60] sm:$0xff] %v640_v46 }
 0x1d3   : > { %657 = vst [vmem:[%s1306_s5 + $0x68] sm:$0xff] %v641_v48 }
 0x1d4   : > { %658 = vst [vmem:[%s1306_s5 + $0x70] sm:$0xff] %v642_v49 }
 0x1d5   : > { %659 = vst [vmem:[%s1306_s5 + $0x78] sm:$0xff] %v643_v50 }
 0x1d6 PF: > { %s21_s23 = sadd.s32 1, %s1011_s23   ;;  %s1310_s18 = smov %s995_s19 }
 0x1d7   : > { %p18_p2 = scmp.ge.s32.totalorder %s21_s23, 4   ;;  %s1311_s19 = smov %s999_s20 }
 0x1d8   : > { %s1312_s20 = smov %s1096_s30  ;;  %s1313_s21 = smov %s1007_s22 }
 0x1d9   : > { %s1314_s22 = smov %s1316_s25  ;;  %20 = sbr.rel (!%p18_p2) target bundleno = 6 (0x6), region = 107 }
 0x1de   :  { %682 = vsyncpa [#allocation4], 1 }
 0x1df   :  { %684 = vsyncpa [#allocation4 + $0x1], 1 }
 0x1e0   :  { %685 = vsyncpa [#allocation6], 1 }
 0x1e1   :  { %687 = vsyncpa [#allocation6 + $0x1], 1 }

</bundles_post_ra>
